<compile_context>
chip_gen: v5e
topology: v5e:2x2
jax: 0.10.0
libtpu: 0.0.40
codegen_flags: <defaults>
</compile_context>

<pallas_src>
import jax
import jax.numpy as jnp
from jax.experimental import pallas as pl
from jax.experimental.pallas import tpu as pltpu


def _mlp_kernel(x_ref, w1_ref, w23_ref, b123_ref, wh_ref, bh_ref, o_ref):
    # Layer 1: (TILE_B, Cin) @ (Cin, H) -> f32 accumulate, f32 bias + ReLU.
    h = jnp.dot(x_ref[...], w1_ref[...], preferred_element_type=jnp.float32)
    h = jnp.maximum(h + b123_ref[0:1, :], 0.0)
    # Layer 2: (TILE_B, H) @ (H, H)
    h = jnp.dot(h.astype(w23_ref.dtype), w23_ref[0], preferred_element_type=jnp.float32)
    h = jnp.maximum(h + b123_ref[1:2, :], 0.0)
    # Layer 3: (TILE_B, H) @ (H, H)
    h = jnp.dot(h.astype(w23_ref.dtype), w23_ref[1], preferred_element_type=jnp.float32)
    h = jnp.maximum(h + b123_ref[2:3, :], 0.0)
    # Fused heads: (TILE_B, H) @ (H, output_dim) + bias.
    out = jnp.dot(h.astype(wh_ref.dtype), wh_ref[...], preferred_element_type=jnp.float32)
    o_ref[...] = (out + bh_ref[...]).astype(o_ref.dtype)


def _round_up(x, m):
    return (x + m - 1) // m * m


def simple_regression_model(x, params, *, tile_b=512, compute_dtype=None):
    """Forward pass of SimpleRegressionModel as one Pallas kernel.

    params = (w1, w23, b123, wh, bh) with shapes
        w1   : (in_channels, hidden)
        w23  : (2, hidden, hidden)    -- stacked layer-2 / layer-3 weights
        b123 : (3, hidden)            -- stacked layer-1/2/3 biases
        wh   : (hidden, output_dim)   -- fused per-head Linear(hidden, 1) weights
        bh   : (1, output_dim)        -- fused head biases

    compute_dtype: if set (e.g. jnp.bfloat16 on v6e/v7x), x and the weights are cast
    to it for the MXU passes; accumulation, biases and ReLU stay in float32.
    """
    w1, w23, b123, wh, bh = params
    batch, in_channels = x.shape
    output_dim = wh.shape[1]
    out_dtype = x.dtype

    if compute_dtype is not None:
        x = x.astype(compute_dtype)
        w1 = w1.astype(compute_dtype)
        w23 = w23.astype(compute_dtype)
        wh = wh.astype(compute_dtype)
        # b123 / bh intentionally stay float32.

    # Batch tile: multiple of 16 sublanes (safe for f32 and bf16 packing), capped by
    # the (rounded-up) batch. Ragged batches are handled by zero-padding + final slice.
    tile_b = max(16, min(int(tile_b), _round_up(batch, 16)))
    tile_b = _round_up(tile_b, 16)
    n_tiles = pl.cdiv(batch, tile_b)
    padded_batch = n_tiles * tile_b
    if padded_batch != batch:
        x = jnp.pad(x, ((0, padded_batch - batch), (0, 0)))

    def resident(shape):
        # Same block index every grid step -> stays VMEM-resident, DMA'd once.
        return pl.BlockSpec(shape, lambda i, _n=len(shape): (0,) * _n)

    out = pl.pallas_call(
        _mlp_kernel,
        out_shape=jax.ShapeDtypeStruct((padded_batch, output_dim), out_dtype),
        grid=(n_tiles,),
        in_specs=[
            pl.BlockSpec((tile_b, in_channels), lambda i: (i, 0)),  # x tile (pipelined)
            resident(w1.shape),
            resident(w23.shape),
            resident(b123.shape),
            resident(wh.shape),
            resident(bh.shape),
        ],
        out_specs=pl.BlockSpec((tile_b, output_dim), lambda i: (i, 0)),
        compiler_params=pltpu.CompilerParams(
            # Batch tiles are independent -> shard grid steps across TensorCores (v7x).
            dimension_semantics=("parallel",),
            # Tiles here are tiny (KBs); default scoped VMEM is ample even on v5e.
        ),
    )(x, w1, w23, b123, wh, bh)

    return out[:batch]


def init_params(key, in_channels=2, hidden_dim=16, output_dim=1, dtype=jnp.float32):
    """Deterministic parameter init in the packed layout described above."""
    ks = jax.random.split(key, 8)
    w1 = jax.random.normal(ks[0], (in_channels, hidden_dim), dtype) * 0.1
    w2 = jax.random.normal(ks[1], (hidden_dim, hidden_dim), dtype) * 0.1
    w3 = jax.random.normal(ks[2], (hidden_dim, hidden_dim), dtype) * 0.1
    b1 = jax.random.normal(ks[3], (hidden_dim,), dtype) * 0.1
    b2 = jax.random.normal(ks[4], (hidden_dim,), dtype) * 0.1
    b3 = jax.random.normal(ks[5], (hidden_dim,), dtype) * 0.1
    wh = jax.random.normal(ks[6], (hidden_dim, output_dim), dtype) * 0.1
    bh = jax.random.normal(ks[7], (1, output_dim), dtype) * 0.1
    w23 = jnp.stack([w2, w3])          # (2, H, H)
    b123 = jnp.stack([b1, b2, b3])     # (3, H)
    return (w1, w23, b123, wh, bh)


def reference_forward(x, params):
    w1, w23, b123, wh, bh = params
    h = jnp.maximum(x @ w1 + b123[0:1], 0.0)
    h = jnp.maximum(h @ w23[0] + b123[1:2], 0.0)
    h = jnp.maximum(h @ w23[1] + b123[2:3], 0.0)
    return h @ wh + bh


if __name__ == "__main__":
    key = jax.random.PRNGKey(0)
    k_x, k_p, k_x2, k_p2 = jax.random.split(key, 4)

    # Test 1: module defaults (in=2, hidden=16, output_dim=1), tiny batch (one grid step).
    x = jax.random.normal(k_x, (8, 2), jnp.float32)
    params = init_params(k_p, in_channels=2, hidden_dim=16, output_dim=1)
    out = jax.block_until_ready(simple_regression_model(x, params))
    ref = reference_forward(x, params)
    assert out.shape == (8, 1), out.shape
    assert jnp.allclose(out, ref, atol=1e-5, rtol=1e-5), "f32 mismatch (small batch)"

    # Test 2: ragged batch, multi-step grid, fused 3-head output.
    x2 = jax.random.normal(k_x2, (300, 2), jnp.float32)
    params2 = init_params(k_p2, in_channels=2, hidden_dim=16, output_dim=3)
    out2 = jax.block_until_ready(simple_regression_model(x2, params2, tile_b=128))
    ref2 = reference_forward(x2, params2)
    assert out2.shape == (300, 3), out2.shape
    assert jnp.allclose(out2, ref2, atol=1e-5, rtol=1e-5), "f32 mismatch (tiled batch)"

    # Test 3: bf16 matmul operands (v6e/v7x path), f32 accumulation / bias / ReLU.
    out3 = jax.block_until_ready(
        simple_regression_model(x2, params2, tile_b=128, compute_dtype=jnp.bfloat16))
    assert out3.shape == (300, 3), out3.shape
    assert jnp.allclose(out3, ref2, atol=5e-2, rtol=5e-2), "bf16 mismatch"

    print("KERNEL_OK")
</pallas_src>

<mosaic_0001>
module attributes {stable_mosaic.version = 11 : i64} {
  func.func @_mlp_kernel(%arg0: i32, %arg1: memref<16x2xf32, #tpu.memory_space<vmem>>, %arg2: memref<2x16xf32, #tpu.memory_space<vmem>>, %arg3: memref<2x16x16xf32, #tpu.memory_space<vmem>>, %arg4: memref<3x16xf32, #tpu.memory_space<vmem>>, %arg5: memref<16x1xf32, #tpu.memory_space<vmem>>, %arg6: memref<1x1xf32, #tpu.memory_space<vmem>>, %arg7: memref<16x1xf32, #tpu.memory_space<vmem>>) attributes {dimension_semantics = [#tpu.dimension_semantics<parallel>], iteration_bounds = array<i64: 1>, scalar_prefetch = 0 : i64, scratch_operands = 0 : i64, tpu.core_type = #tpu.core_type<tc>, window_params = [{transform_indices = @transform_0, window_bounds = array<i64: 16, 2>}, {pipeline_mode = #tpu.pipeline_mode<synchronous>, transform_indices = @transform_1, window_bounds = array<i64: 2, 16>}, {pipeline_mode = #tpu.pipeline_mode<synchronous>, transform_indices = @transform_2, window_bounds = array<i64: 2, 16, 16>}, {pipeline_mode = #tpu.pipeline_mode<synchronous>, transform_indices = @transform_3, window_bounds = array<i64: 3, 16>}, {pipeline_mode = #tpu.pipeline_mode<synchronous>, transform_indices = @transform_4, window_bounds = array<i64: 16, 1>}, {pipeline_mode = #tpu.pipeline_mode<synchronous>, transform_indices = @transform_5, window_bounds = array<i64: 1, 1>}, {transform_indices = @transform_6, window_bounds = array<i64: 16, 1>}]} {
    %c0 = arith.constant 0 : index
    %c0_0 = arith.constant 0 : index
    %0 = vector.load %arg1[%c0, %c0_0] : memref<16x2xf32, #tpu.memory_space<vmem>>, vector<16x2xf32>
    %c0_1 = arith.constant 0 : index
    %c0_2 = arith.constant 0 : index
    %1 = vector.load %arg2[%c0_1, %c0_2] : memref<2x16xf32, #tpu.memory_space<vmem>>, vector<2x16xf32>
    %cst = arith.constant dense<0.000000e+00> : vector<16x16xf32>
    %2 = tpu.matmul %0, %1, %cst {dimension_numbers = #tpu.dot_dimension_numbers<[1], [0], [0], [1], [0, 0, 1, 1], [], []>} : vector<16x2xf32>, vector<2x16xf32>, vector<16x16xf32> -> vector<16x16xf32>
    %c0_3 = arith.constant 0 : index
    %c0_4 = arith.constant 0 : index
    %3 = vector.load %arg4[%c0_3, %c0_4] : memref<3x16xf32, #tpu.memory_space<vmem>>, vector<1x16xf32>
    %4 = vector.broadcast %3 : vector<1x16xf32> to vector<16x16xf32>
    %5 = arith.addf %2, %4 : vector<16x16xf32>
    %cst_5 = arith.constant 0.000000e+00 : f32
    %6 = vector.broadcast %cst_5 : f32 to vector<16x16xf32>
    %7 = arith.maximumf %5, %6 : vector<16x16xf32>
    %c0_6 = arith.constant 0 : index
    %c0_7 = arith.constant 0 : index
    %c0_8 = arith.constant 0 : index
    %8 = vector.load %arg3[%c0_6, %c0_7, %c0_8] : memref<2x16x16xf32, #tpu.memory_space<vmem>>, vector<1x16x16xf32>
    %9 = vector.shape_cast %8 : vector<1x16x16xf32> to vector<16x16xf32>
    %cst_9 = arith.constant dense<0.000000e+00> : vector<16x16xf32>
    %10 = tpu.matmul %7, %9, %cst_9 {dimension_numbers = #tpu.dot_dimension_numbers<[1], [0], [0], [1], [0, 0, 1, 1], [], []>} : vector<16x16xf32>, vector<16x16xf32>, vector<16x16xf32> -> vector<16x16xf32>
    %c1 = arith.constant 1 : index
    %c0_10 = arith.constant 0 : index
    %11 = vector.load %arg4[%c1, %c0_10] : memref<3x16xf32, #tpu.memory_space<vmem>>, vector<1x16xf32>
    %12 = vector.broadcast %11 : vector<1x16xf32> to vector<16x16xf32>
    %13 = arith.addf %10, %12 : vector<16x16xf32>
    %cst_11 = arith.constant 0.000000e+00 : f32
    %14 = vector.broadcast %cst_11 : f32 to vector<16x16xf32>
    %15 = arith.maximumf %13, %14 : vector<16x16xf32>
    %c1_12 = arith.constant 1 : index
    %c0_13 = arith.constant 0 : index
    %c0_14 = arith.constant 0 : index
    %16 = vector.load %arg3[%c1_12, %c0_13, %c0_14] : memref<2x16x16xf32, #tpu.memory_space<vmem>>, vector<1x16x16xf32>
    %17 = vector.shape_cast %16 : vector<1x16x16xf32> to vector<16x16xf32>
    %cst_15 = arith.constant dense<0.000000e+00> : vector<16x16xf32>
    %18 = tpu.matmul %15, %17, %cst_15 {dimension_numbers = #tpu.dot_dimension_numbers<[1], [0], [0], [1], [0, 0, 1, 1], [], []>} : vector<16x16xf32>, vector<16x16xf32>, vector<16x16xf32> -> vector<16x16xf32>
    %c2 = arith.constant 2 : index
    %c0_16 = arith.constant 0 : index
    %19 = vector.load %arg4[%c2, %c0_16] : memref<3x16xf32, #tpu.memory_space<vmem>>, vector<1x16xf32>
    %20 = vector.broadcast %19 : vector<1x16xf32> to vector<16x16xf32>
    %21 = arith.addf %18, %20 : vector<16x16xf32>
    %cst_17 = arith.constant 0.000000e+00 : f32
    %22 = vector.broadcast %cst_17 : f32 to vector<16x16xf32>
    %23 = arith.maximumf %21, %22 : vector<16x16xf32>
    %c0_18 = arith.constant 0 : index
    %c0_19 = arith.constant 0 : index
    %24 = vector.load %arg5[%c0_18, %c0_19] : memref<16x1xf32, #tpu.memory_space<vmem>>, vector<16x1xf32>
    %cst_20 = arith.constant dense<0.000000e+00> : vector<16x1xf32>
    %25 = tpu.matmul %23, %24, %cst_20 {dimension_numbers = #tpu.dot_dimension_numbers<[1], [0], [0], [1], [0, 0, 1, 1], [], []>} : vector<16x16xf32>, vector<16x1xf32>, vector<16x1xf32> -> vector<16x1xf32>
    %c0_21 = arith.constant 0 : index
    %c0_22 = arith.constant 0 : index
    %26 = vector.load %arg6[%c0_21, %c0_22] : memref<1x1xf32, #tpu.memory_space<vmem>>, vector<1x1xf32>
    %27 = vector.broadcast %26 : vector<1x1xf32> to vector<16x1xf32>
    %28 = arith.addf %25, %27 : vector<16x1xf32>
    %c0_23 = arith.constant 0 : index
    %c0_24 = arith.constant 0 : index
    %29 = vector.load %arg7[%c0_23, %c0_24] : memref<16x1xf32, #tpu.memory_space<vmem>>, vector<16x1xf32>
    tpu.vector_store %arg7[%c0_23, %c0_24], %28 {strides = array<i32>} : memref<16x1xf32, #tpu.memory_space<vmem>>, vector<16x1xf32>,
    return
  }
  func.func @transform_0(%arg0: i32) -> (i32, i32) {
    %c0_i32 = arith.constant 0 : i32
    %c0_i32_0 = arith.constant 0 : i32
    return %arg0, %c0_i32 : i32, i32
  }
  func.func @transform_1(%arg0: i32) -> (i32, i32) {
    %c0_i32 = arith.constant 0 : i32
    %c0_i32_0 = arith.constant 0 : i32
    %c0_i32_1 = arith.constant 0 : i32
    return %c0_i32, %c0_i32_0 : i32, i32
  }
  func.func @transform_2(%arg0: i32) -> (i32, i32, i32) {
    %c0_i32 = arith.constant 0 : i32
    %c0_i32_0 = arith.constant 0 : i32
    %c0_i32_1 = arith.constant 0 : i32
    %c0_i32_2 = arith.constant 0 : i32
    return %c0_i32, %c0_i32_0, %c0_i32_1 : i32, i32, i32
  }
  func.func @transform_3(%arg0: i32) -> (i32, i32) {
    %c0_i32 = arith.constant 0 : i32
    %c0_i32_0 = arith.constant 0 : i32
    %c0_i32_1 = arith.constant 0 : i32
    return %c0_i32, %c0_i32_0 : i32, i32
  }
  func.func @transform_4(%arg0: i32) -> (i32, i32) {
    %c0_i32 = arith.constant 0 : i32
    %c0_i32_0 = arith.constant 0 : i32
    %c0_i32_1 = arith.constant 0 : i32
    return %c0_i32, %c0_i32_0 : i32, i32
  }
  func.func @transform_5(%arg0: i32) -> (i32, i32) {
    %c0_i32 = arith.constant 0 : i32
    %c0_i32_0 = arith.constant 0 : i32
    %c0_i32_1 = arith.constant 0 : i32
    return %c0_i32, %c0_i32_0 : i32, i32
  }
  func.func @transform_6(%arg0: i32) -> (i32, i32) {
    %c0_i32 = arith.constant 0 : i32
    %c0_i32_0 = arith.constant 0 : i32
    return %arg0, %c0_i32 : i32, i32
  }
}

</mosaic_0001>

<bundles_post_ra>
// kernel: tpu_custom_call.1
= control target key start
LH: loop header
LB: loop body
LE: loop exit
PB: predicated region body
PF: predicated region fallthrough
CT: control target
= control target key end

     0   :  { %s318_s0 = inlined_call_operand.vmem [shape: f32[16,2], index: 0, kind: input, shape index: {}]   ;;  %s319_s1 = inlined_call_operand.vmem [shape: f32[2,16], index: 1, kind: input, shape index: {}]   ;;  %s320_s2 = inlined_call_operand.vmem [shape: f32[2,16,16], index: 2, kind: input, shape index: {}]   ;;  %s321_s3 = inlined_call_operand.hbm [shape: f32[3,16], index: 3, kind: input, shape index: {}]   ;;  %s322_s4 = inlined_call_operand.vmem [shape: f32[16,1], index: 4, kind: input, shape index: {}]   ;;  %s323_s5 = inlined_call_operand.<no memory space> [shape: f32[1,1], index: 5, kind: input, shape index: {}]   ;;  %s324_s6 = inlined_call_operand.vmem [shape: f32[16,1], index: 6, kind: output, shape index: {}]  }
   0x1   :  { %v11_v0 = vstv %s323_s5 }
   0x2   :  { %12 = vst [vmem:[#allocation2] sm:$0x1] %v11_v0 }
   0x3   :  { %13 = vsyncpa [#allocation4], 0  ;;  %s25_s25 = sshll.u32 %s321_s3, 4  ;;  %s237_s26 = smov [#allocation3]   ;;  %s26_s25 = int_to_ptr.hbm [resolvable:$true] %s25_s25 }
   0x4   :  { %s27_s27 = sshll.u32 %s237_s26, 4  ;;  %s28_s27 = int_to_ptr.vmem [resolvable:$true] %s27_s27 }
   0x5   :  { %30 = dma.hbm_to_vmem [thread:$0]  %s26_s25, 64, %s28_s27, [#allocation4]  }
   0x6   :  { %235 = dma.done.wait [#allocation4], 64  }
   0x7   :  { %236 = vsyncadd [#allocation4], 4294967232  ;;  %vm51_vm0 = vcmask 1041408   ;;  %vm44_vm1 = vcmask 15360   ;;  %v41_v1 = vld [vmem:[%s319_s1] sm:$0x3] }
   0x8   :  { %v39_v2 = vld [vmem:[%s318_s0] sm:$0xff]  ;;  %195 = vmatpush.msk.msra.mxu0 %vm51_vm0, %v41_v1  ;;  %v40_v3 = vld [vmem:[%s318_s0 + $0x8] sm:$0xff]  ;;  %vm84_vm2 = vcmask 130048   ;;  %v201_v13 = vld [vmem:[%s320_s2 + $0x18] sm:$0xff]  ;;  %vm187_vm3 = vcmask 7168  }
   0x9   :  { %196 = vmatmul.msk.f32.vlgmr.msra.gmra.mxu0 %vm44_vm1, %v39_v2  ;;  %v81_v4 = vld [vmem:[%s320_s2 + $0x8] sm:$0xff]  ;;  %v80_v5 = vld [vmem:[%s320_s2] sm:$0xff]  ;;  %141 = vmatpush.msra.mxu2 %v201_v13  ;;  %v200_v14 = vld [vmem:[%s320_s2 + $0x10] sm:$0xff] }
   0xa   :  { %105 = vmatpush.msra.mxu1 %v81_v4  ;;  %v207_v6 = vld [vmem:[#allocation3] ss:$0 sm:$0xff]  ;;  %v208_v15 = vld [vmem:[#allocation3 + $0x1] ss:$0 sm:$0xff]  ;;  %v153_v22 = vld [vmem:[%s322_s4 + $0x8] sm:$0xff] }
   0xb   :  { %142 = vmatpush.msra.mxu2 %v200_v14  ;;  %178 = vmatpush.msra.mxu3 %v153_v22  ;;  %v152_v23 = vld [vmem:[%s322_s4] sm:$0xff] }
   0xc   :  { %106 = vmatpush.msra.mxu1 %v80_v5  ;;  %v209_v24 = vld [vmem:[#allocation3 + $0x2] ss:$0 sm:$0xff]  ;;  %v210_v31 = vld [vmem:[#allocation2] ss:$0 sm:$0xff] }
   0xd   :  { %179 = vmatpush.msra.mxu3 %v152_v23 }
  0x11   :  { %197 = vmatmul.msk.f32.gmra.mxu0 %vm44_vm1, %v40_v3 }
  0x86   :  { %v72_v7 = vpop.f32.mrf.mxu0 }
  0x87   :  { %v73_v8 = vadd.f32 %v207_v6, %v72_v7 }
  0x89   :  { %v78_v9 = vmax.f32 %v73_v8, 0.0 }
  0x8b   :  { %198 = vmatmul.msk.f32.vlgmr.msra.gmra.mxu1 %vm84_vm2, %v78_v9 }
  0x8e   :  { %v75_v10 = vpop.f32.mrf.mxu0 }
  0x8f   :  { %v76_v11 = vadd.f32 %v207_v6, %v75_v10 }
  0x91   :  { %v79_v12 = vmax.f32 %v76_v11, 0.0 }
  0x93   :  { %199 = vmatmul.msk.f32.gmra.mxu1 %vm84_vm2, %v79_v12 }
 0x108   :  { %v108_v16 = vpop.f32.mrf.mxu1 }
 0x109   :  { %v109_v17 = vadd.f32 %v208_v15, %v108_v16 }
 0x10b   :  { %v114_v18 = vmax.f32 %v109_v17, 0.0 }
 0x10d   :  { %202 = vmatmul.msk.f32.vlgmr.msra.gmra.mxu2 %vm84_vm2, %v114_v18 }
 0x110   :  { %v111_v19 = vpop.f32.mrf.mxu1 }
 0x111   :  { %v112_v20 = vadd.f32 %v208_v15, %v111_v19 }
 0x113   :  { %v115_v21 = vmax.f32 %v112_v20, 0.0 }
 0x115   :  { %203 = vmatmul.msk.f32.gmra.mxu2 %vm84_vm2, %v115_v21 }
 0x190   :  { %v144_v25 = vpop.f32.mrf.mxu2 }
 0x191   :  { %v145_v26 = vadd.f32 %v209_v24, %v144_v25 }
 0x193   :  { %v150_v27 = vmax.f32 %v145_v26, 0.0 }
 0x195   :  { %204 = vmatmul.msk.f32.vlgmr.msra.gmra.mxu3 %vm84_vm2, %v150_v27 }
 0x198   :  { %v147_v28 = vpop.f32.mrf.mxu2 }
 0x199   :  { %v148_v29 = vadd.f32 %v209_v24, %v147_v28 }
 0x19b   :  { %v151_v30 = vmax.f32 %v148_v29, 0.0 }
 0x19d   :  { %205 = vmatmul.msk.f32.gmra.mxu3 %vm84_vm2, %v151_v30 }
 0x218   :  { %v181_v32 = vpop.f32.mrf.mxu3 }
 0x219   :  { %v182_v33 = vadd.f32 %v210_v31, %v181_v32 }
 0x21b   :  { %188 = vst.msk [vmem:[%s324_s6] sm:$0xff] %vm187_vm3, %v182_v33 }
 0x220   :  { %v184_v34 = vpop.f32.mrf.mxu3 }
 0x221   :  { %v185_v35 = vadd.f32 %v210_v31, %v184_v34 }
 0x223   :  { %189 = vst.msk [vmem:[%s324_s6 + $0x8] sm:$0xff] %vm187_vm3, %v185_v35 }
 0x224   :  { %194 = vsyncpa [#allocation4], 1 }

</bundles_post_ra>
